<compile_context>
chip_gen: v7x
topology: tpu7x:2x2x1
jax: 0.10.0
libtpu: 0.0.40
codegen_flags: <defaults>
</compile_context>

<pallas_src>
import functools

import jax
import jax.numpy as jnp
from jax.experimental import pallas as pl
from jax.experimental.pallas import tpu as pltpu


def _round_up(x, m):
    return ((x + m - 1) // m) * m


def _vmem_capacity_bytes():
    """Physical per-core VMEM; conservative fallback (v7x = 64 MiB) if the query fails."""
    try:
        return int(pltpu.get_tpu_info().vmem_capacity_bytes)
    except Exception:
        return 64 * 1024 * 1024


def _tile_vmem_usage(tm, tn, tk, w_itemsize, out_itemsize):
    """Double-buffered x / w / bias / out blocks (BlockSpec pipelining) + f32 acc scratch."""
    return (2 * tm * tk * 2                 # x blocks (bf16)
            + 2 * tk * tn * w_itemsize      # sign(W)^T blocks
            + 2 * tn * 4                    # bias blocks (f32)
            + 2 * tm * tn * out_itemsize    # output blocks
            + tm * tn * 4)                  # f32 accumulator scratch


def choose_binary_linear_tiles(batch, out_features, in_features,
                               *, w_itemsize=1, out_itemsize=4):
    """Pick (tm, tn, tk) as large as the problem and this chip's VMEM allow."""
    budget = int(_vmem_capacity_bytes() * 0.85)     # leave compiler headroom

    tm = min(1536, _round_up(batch, 8))
    tn = min(1536, _round_up(out_features, 128))
    tk = min(2048, _round_up(in_features, 128))

    # Shrink (largest dim first) until the double-buffered working set fits.
    while _tile_vmem_usage(tm, tn, tk, w_itemsize, out_itemsize) > budget:
        if tk >= max(tm, tn) and tk > 512:
            tk = _round_up(tk // 2, 128)
        elif tm >= tn and tm > 128:
            tm = max(8, _round_up(tm // 2, 8))
        elif tn > 128:
            tn = _round_up(tn // 2, 128)
        else:
            break

    # v7x megacore: ensure at least one "parallel" axis has >= 2 blocks so the
    # second TensorCore isn't idle when the whole problem fits a single tile.
    if (_round_up(batch, tm) // tm == 1
            and _round_up(out_features, tn) // tn == 1
            and tn >= 256):
        tn = _round_up(tn // 2, 128)

    return tm, tn, tk


def prepare_binary_linear_params(weight, bias, *, tn, tk, w_store_dtype=jnp.int8):
    """One-time parameter preprocessing (hoist out of the per-call hot path).

    sign(W)/sign(b) are exactly representable in int8 / f32; the weight is
    pre-transposed to (in, out) so the kernel does no in-kernel sign() or XLU
    transpose, and both are pre-padded to the kernel's tile multiples.
    """
    N, K = weight.shape
    assert bias.shape == (N,)
    Kp = _round_up(K, tk)
    Np = _round_up(N, tn)
    # jnp.sign maps 0 -> 0, matching torch.sign; use where(w >= 0, 1, -1) if
    # strict {-1, +1} semantics are ever required instead.
    w_bin = jnp.sign(weight).astype(w_store_dtype).T            # (K, N)
    b_bin = jnp.sign(bias).astype(jnp.float32).reshape(1, N)    # (1, N)
    # Zero padding: padded K rows contribute 0 to the dot; padded N cols are
    # sliced off in the wrapper.
    w_p = jnp.pad(w_bin, ((0, Kp - K), (0, Np - N)))
    b_p = jnp.pad(b_bin, ((0, 0), (0, Np - N)))
    return w_p, b_p


def _binary_linear_kernel(x_ref, w_ref, b_ref, o_ref, acc_ref):
    """Computes one (tm, tn) output tile; grid axis 2 (last) is the K reduction."""
    k = pl.program_id(2)

    # int8 {-1, 0, +1} -> bf16 on the VPU (exact); hidden under the weight DMA.
    w = w_ref[...].astype(jnp.float32).astype(jnp.bfloat16)
    prod = jnp.dot(x_ref[...], w, preferred_element_type=jnp.float32)

    @pl.when(k == 0)
    def _first():                 # direct store: no zero-init store + re-read
        acc_ref[...] = prod

    @pl.when(k > 0)
    def _accumulate():
        acc_ref[...] += prod

    @pl.when(k == pl.num_programs(2) - 1)
    def _finalize():              # bias add + output cast exactly once
        o_ref[...] = (acc_ref[...] + b_ref[...]).astype(o_ref.dtype)


def binary_linear_prepared(x, w_p, b_p, out_features, *, tiles):
    """y = x @ sign(W)^T + sign(b) with W/b already binarized/padded by
    prepare_binary_linear_params (weight preprocessing off the hot path)."""
    tm, tn, tk = tiles
    B, K = x.shape
    Kp, Np = w_p.shape
    assert K <= Kp and Kp % tk == 0 and Np % tn == 0
    assert b_p.shape == (1, Np)
    out_dtype = x.dtype
    out_itemsize = jnp.dtype(out_dtype).itemsize

    tm = min(tm, _round_up(B, 8))
    Mp = _round_up(B, tm)

    # Activations go to the MXU in bf16 (weights/bias are exactly binary, so
    # only this cast differs from the pure-f32 PyTorch reference).
    # TODO(synk): add an f32-activation (3-pass bf16) path if exact f32 parity is needed.
    x_p = jnp.pad(x.astype(jnp.bfloat16), ((0, Mp - B), (0, Kp - K)))

    grid = (Mp // tm, Np // tn, Kp // tk)
    gm, gn, _ = grid

    # Accurate advisory cost: this schedule re-reads x once per output-column
    # block and w once per output-row block.
    flops = 2 * B * out_features * K
    bytes_accessed = (x_p.size * 2 * gn
                      + w_p.size * w_p.dtype.itemsize * gm
                      + b_p.size * 4 * gm
                      + Mp * Np * out_itemsize)

    # VMEM limit derived from the actual tile working set + headroom, capped
    # below this generation's physical VMEM (64 MiB v7x / 128 MiB v5e, v6e).
    needed = _tile_vmem_usage(tm, tn, tk, w_p.dtype.itemsize, out_itemsize)
    cap = int(_vmem_capacity_bytes() * 0.9)
    vmem_limit = max(min(cap, needed + (16 << 20)), min(32 << 20, cap))

    out_p = pl.pallas_call(
        _binary_linear_kernel,
        out_shape=jax.ShapeDtypeStruct((Mp, Np), out_dtype),
        grid_spec=pltpu.PrefetchScalarGridSpec(
            num_scalar_prefetch=0,
            grid=grid,
            in_specs=[
                pl.BlockSpec((tm, tk), lambda i, j, k: (i, k)),   # x (bf16)
                pl.BlockSpec((tk, tn), lambda i, j, k: (k, j)),   # sign(W)^T (int8)
                pl.BlockSpec((1, tn), lambda i, j, k: (0, j)),    # sign(b) (f32)
            ],
            out_specs=pl.BlockSpec((tm, tn), lambda i, j, k: (i, j)),
            scratch_shapes=[pltpu.VMEM((tm, tn), jnp.float32)],
        ),
        compiler_params=pltpu.CompilerParams(
            dimension_semantics=("parallel", "parallel", "arbitrary"),
            vmem_limit_bytes=vmem_limit,
        ),
        cost_estimate=pl.CostEstimate(
            flops=flops, transcendentals=0, bytes_accessed=bytes_accessed),
    )(x_p, w_p, b_p)

    return out_p[:B, :out_features]


def binary_linear(x, weight, bias, *, tiles=None):
    """Convenience path (binarizes W/b inline).  For repeated forwards, hoist
    choose_binary_linear_tiles + prepare_binary_linear_params out of the call
    and use binary_linear_prepared directly."""
    B, K = x.shape
    N, K2 = weight.shape
    assert K == K2 and bias.shape == (N,)
    if tiles is None:
        tiles = choose_binary_linear_tiles(B, N, K)
    w_p, b_p = prepare_binary_linear_params(weight, bias, tn=tiles[1], tk=tiles[2])
    return binary_linear_prepared(x, w_p, b_p, N, tiles=tiles)


if __name__ == "__main__":
    batch, in_features, out_features = 8, 32, 16

    key = jax.random.PRNGKey(0)
    kx, kw, kb = jax.random.split(key, 3)

    # Deterministic "init": weight, bias ~ N(0, 1), matching nn.init.normal_.
    x = jax.random.normal(kx, (batch, in_features), dtype=jnp.float32)
    weight = jax.random.normal(kw, (out_features, in_features), dtype=jnp.float32)
    bias = jax.random.normal(kb, (out_features,), dtype=jnp.float32)

    # One-time (cached) parameter preprocessing, then the jitted hot path.
    tiles = choose_binary_linear_tiles(batch, out_features, in_features)
    w_p, b_p = prepare_binary_linear_params(weight, bias, tn=tiles[1], tk=tiles[2])
    fwd = jax.jit(functools.partial(binary_linear_prepared,
                                    out_features=out_features, tiles=tiles))
    out = fwd(x, w_p, b_p)
    jax.block_until_ready(out)

    # Also exercise the convenience (un-cached) wrapper.
    out2 = jax.jit(binary_linear)(x, weight, bias)
    jax.block_until_ready(out2)

    # Reference check.  The kernel feeds x to the MXU in bf16 (sign(W)/sign(b)
    # are exact), so compare tightly against the bf16-activation reference and
    # loosely against the pure-f32 reference.
    w_sign = jnp.sign(weight)
    b_sign = jnp.sign(bias)
    ref_bf16 = (x.astype(jnp.bfloat16).astype(jnp.float32) @ w_sign.T
                + b_sign[None, :])
    ref_f32 = x @ w_sign.T + b_sign[None, :]

    assert out.shape == (batch, out_features)
    assert jnp.allclose(out, ref_bf16, atol=1e-3, rtol=1e-3), \
        "mismatch vs bf16-activation reference"
    assert jnp.allclose(out, ref_f32, atol=5e-2, rtol=5e-2), \
        "mismatch vs f32 reference"
    assert jnp.allclose(out, out2), "cached vs inline wrapper mismatch"

    print("KERNEL_OK")
</pallas_src>

<mosaic_0001>
module attributes {stable_mosaic.version = 11 : i64} {
  func.func @_binary_linear_kernel(%arg0: i32, %arg1: i32, %arg2: i32, %arg3: memref<8x128xbf16, #tpu.memory_space<vmem>>, %arg4: memref<128x128xi8, #tpu.memory_space<vmem>>, %arg5: memref<1x128xf32, #tpu.memory_space<vmem>>, %arg6: memref<8x128xf32, #tpu.memory_space<vmem>>, %arg7: memref<8x128xf32, #tpu.memory_space<vmem>>) attributes {dimension_semantics = [#tpu.dimension_semantics<parallel>, #tpu.dimension_semantics<parallel>, #tpu.dimension_semantics<arbitrary>], iteration_bounds = array<i64: 1, 1, 1>, scalar_prefetch = 0 : i64, scratch_operands = 1 : i64, tpu.core_type = #tpu.core_type<tc>, window_params = [{transform_indices = @transform_0, window_bounds = array<i64: 8, 128>}, {transform_indices = @transform_1, window_bounds = array<i64: 128, 128>}, {transform_indices = @transform_2, window_bounds = array<i64: 1, 128>}, {transform_indices = @transform_3, window_bounds = array<i64: 8, 128>}]} {
    %c0 = arith.constant 0 : index
    %c0_0 = arith.constant 0 : index
    %0 = vector.load %arg4[%c0, %c0_0] : memref<128x128xi8, #tpu.memory_space<vmem>>, vector<128x128xi8>
    %1 = arith.sitofp %0 : vector<128x128xi8> to vector<128x128xf32>
    %2 = arith.truncf %1 : vector<128x128xf32> to vector<128x128xbf16>
    %c0_1 = arith.constant 0 : index
    %c0_2 = arith.constant 0 : index
    %3 = vector.load %arg3[%c0_1, %c0_2] : memref<8x128xbf16, #tpu.memory_space<vmem>>, vector<8x128xbf16>
    %cst = arith.constant dense<0.000000e+00> : vector<8x128xf32>
    %4 = tpu.matmul %3, %2, %cst {dimension_numbers = #tpu.dot_dimension_numbers<[1], [0], [0], [1], [0, 0, 1, 1], [], []>} : vector<8x128xbf16>, vector<128x128xbf16>, vector<8x128xf32> -> vector<8x128xf32>
    %c0_i32 = arith.constant 0 : i32
    %5 = arith.cmpi eq, %arg2, %c0_i32 : i32
    %6 = arith.extui %5 : i1 to i32
    %c0_i32_3 = arith.constant 0 : i32
    %7 = arith.cmpi ne, %6, %c0_i32_3 : i32
    scf.if %7 {
      %c0_8 = arith.constant 0 : index
      %c0_9 = arith.constant 0 : index
      %14 = vector.load %arg7[%c0_8, %c0_9] : memref<8x128xf32, #tpu.memory_space<vmem>>, vector<8x128xf32>
      tpu.vector_store %arg7[%c0_8, %c0_9], %4 {strides = array<i32>} : memref<8x128xf32, #tpu.memory_space<vmem>>, vector<8x128xf32>,
    } else {
    }
    %c0_i32_4 = arith.constant 0 : i32
    %8 = arith.cmpi sgt, %arg2, %c0_i32_4 : i32
    %9 = arith.extui %8 : i1 to i32
    %c0_i32_5 = arith.constant 0 : i32
    %10 = arith.cmpi ne, %9, %c0_i32_5 : i32
    scf.if %10 {
      %c0_8 = arith.constant 0 : index
      %c0_9 = arith.constant 0 : index
      %14 = vector.load %arg7[%c0_8, %c0_9] : memref<8x128xf32, #tpu.memory_space<vmem>>, vector<8x128xf32>
      %15 = arith.addf %14, %4 : vector<8x128xf32>
      %c0_10 = arith.constant 0 : index
      %c0_11 = arith.constant 0 : index
      %16 = vector.load %arg7[%c0_10, %c0_11] : memref<8x128xf32, #tpu.memory_space<vmem>>, vector<8x128xf32>
      tpu.vector_store %arg7[%c0_10, %c0_11], %15 {strides = array<i32>} : memref<8x128xf32, #tpu.memory_space<vmem>>, vector<8x128xf32>,
    } else {
    }
    %c0_i32_6 = arith.constant 0 : i32
    %11 = arith.cmpi eq, %arg2, %c0_i32_6 : i32
    %12 = arith.extui %11 : i1 to i32
    %c0_i32_7 = arith.constant 0 : i32
    %13 = arith.cmpi ne, %12, %c0_i32_7 : i32
    scf.if %13 {
      %c0_8 = arith.constant 0 : index
      %c0_9 = arith.constant 0 : index
      %14 = vector.load %arg7[%c0_8, %c0_9] : memref<8x128xf32, #tpu.memory_space<vmem>>, vector<8x128xf32>
      %c0_10 = arith.constant 0 : index
      %c0_11 = arith.constant 0 : index
      %15 = vector.load %arg5[%c0_10, %c0_11] : memref<1x128xf32, #tpu.memory_space<vmem>>, vector<1x128xf32>
      %16 = vector.broadcast %15 : vector<1x128xf32> to vector<8x128xf32>
      %17 = arith.addf %14, %16 : vector<8x128xf32>
      %c0_12 = arith.constant 0 : index
      %c0_13 = arith.constant 0 : index
      %18 = vector.load %arg6[%c0_12, %c0_13] : memref<8x128xf32, #tpu.memory_space<vmem>>, vector<8x128xf32>
      tpu.vector_store %arg6[%c0_12, %c0_13], %17 {strides = array<i32>} : memref<8x128xf32, #tpu.memory_space<vmem>>, vector<8x128xf32>,
    } else {
    }
    return
  }
  func.func @transform_0(%arg0: i32, %arg1: i32, %arg2: i32) -> (i32, i32) {
    %c0_i32 = arith.constant 0 : i32
    return %arg0, %arg2 : i32, i32
  }
  func.func @transform_1(%arg0: i32, %arg1: i32, %arg2: i32) -> (i32, i32) {
    %c0_i32 = arith.constant 0 : i32
    return %arg2, %arg1 : i32, i32
  }
  func.func @transform_2(%arg0: i32, %arg1: i32, %arg2: i32) -> (i32, i32) {
    %c0_i32 = arith.constant 0 : i32
    %c0_i32_0 = arith.constant 0 : i32
    return %c0_i32, %arg1 : i32, i32
  }
  func.func @transform_3(%arg0: i32, %arg1: i32, %arg2: i32) -> (i32, i32) {
    %c0_i32 = arith.constant 0 : i32
    return %arg0, %arg1 : i32, i32
  }
}

</mosaic_0001>

<bundles_post_ra>
// kernel: binary_linear_prepared.1
= control target key start
LH: loop header
LB: loop body
LE: loop exit
PB: predicated region body
PF: predicated region fallthrough
CT: control target
= control target key end

     0   :  { %8 = vsyncpa [#allocation4], 0  ;;  %s263_s0 = inlined_call_operand.vmem [shape: bf16[8,128], index: 0, kind: input, shape index: {}]   ;;  %s264_s1 = inlined_call_operand.hbm [shape: s8[128,128], index: 1, kind: input, shape index: {}]   ;;  %s265_s2 = inlined_call_operand.vmem [shape: f32[1,128], index: 2, kind: input, shape index: {}]   ;;  %s266_s3 = inlined_call_operand.hbm [shape: f32[8,128], index: 3, kind: output, shape index: {}]  }
   0x1   :  { %9 = vsyncpa [#allocation5], 0  ;;  %s207_s12 = smov [#allocation3]   ;;  %s159_s16 = scalar_lea.hbm %s264_s1, 512 }
   0x2   :  { %s17_s13 = sshll.u32 %s207_s12, 4  ;;  %p160_p0 = scmp.ne.s32.totalorder %s264_s1, %s159_s16  ;;  %s18_s13 = int_to_ptr.vmem [resolvable:$true] %s17_s13 }
   0x3   :  { %p163_p1 = scmp.lt.u32.totalorder %s159_s16, %s264_s1 }
   0x5   :  { %p165_p2 = pnand %p163_p1, %p160_p0 }
   0x7   :  { %168 = shalt.err (!%p165_p2)
}
   0x8   :  { %s169_s21 = scalar_lea.vmem %s18_s13, 512  ;;  %p174_p4 = scmp.lt.s32.totalorder %s18_s13, %s18_s13 }
   0x9   :  { %p170_p3 = scmp.ne.s32.totalorder %s18_s13, %s169_s21  ;;  %p175_p5 = scmp.lt.s32.totalorder %s169_s21, %s169_s21 }
   0xb   :  { %p176_p6 = por %p175_p5, %p174_p4 }
   0xd   :  { %p177_p7 = pnand %p176_p6, %p170_p3 }
   0xf   :  { %180 = shalt.err (!%p177_p7)
}
  0x10   :  { %s208_s22 = smov 128   ;;  %s209_s23 = smov 8  }
  0x11   :  { %23 = dma.hbm_to_vmem [thread:$0]  %s264_s1, 512, %s18_s13, [#allocation4], %s208_s22, %s208_s22, %s209_s23  }
  0x12   :  { %203 = dma.done.wait [#allocation4], 512  }
  0x13   :  { %204 = vsyncadd [#allocation4], 4294966784  ;;  %v210_v0 = vmov 0.0   ;;  %vm211_vm0 = vmmov 0   ;;  %v30_v1 = vld [vmem:[#allocation3] sm:$0xff]  ;;  %v31_v4 = vld [vmem:[#allocation3 + $0x8] sm:$0xff] }
  0x14   :  { %133 = vmatprep.subr.bf16.mxu0 %v210_v0  ;;  %149 = vmatprep.mubr.msk.bf16.mxu0 %vm211_vm0, %v210_v0  ;;  %v34_v2 = vunpack.c.l.s8.bf16 %v30_v1  ;;  %v35_v3 = vunpack.c.h.s8.bf16 %v30_v1  ;;  %v36_v5 = vunpack.c.l.s8.bf16 %v31_v4  ;;  %v37_v6 = vunpack.c.h.s8.bf16 %v31_v4  ;;  %v32_v7 = vld [vmem:[#allocation3 + $0x10] sm:$0xff]  ;;  %v33_v10 = vld [vmem:[#allocation3 + $0x18] sm:$0xff]  ;;  %v42_v13 = vld [vmem:[%s263_s0] sm:$0xf]  ;;  %s212_s29 = smov [#allocation6]  }
  0x15   :  { %v38_v8 = vunpack.c.l.s8.bf16 %v32_v7  ;;  %v39_v9 = vunpack.c.h.s8.bf16 %v32_v7  ;;  %v40_v11 = vunpack.c.l.s8.bf16 %v33_v10  ;;  %v41_v12 = vunpack.c.h.s8.bf16 %v33_v10  ;;  %v123_v14 = vld [vmem:[%s265_s2] ss:$0 sm:$0xff]  ;;  %s114_s30 = sshll.u32 %s212_s29, 4  ;;  %s115_s30 = int_to_ptr.vmem [resolvable:$true] %s114_s30 }
  0x16   :  { %134 = vmatpush3.bf16.msra.mxu0 %v34_v2  ;;  %s181_s4 = scalar_lea.vmem %s115_s30, 128  ;;  %p186_p9 = scmp.lt.s32.totalorder %s115_s30, %s115_s30 }
  0x17   :  { %135 = vmatprep.subr.bf16.mxu0 %v210_v0  ;;  %p182_p8 = scmp.ne.s32.totalorder %s115_s30, %s181_s4  ;;  %p187_p10 = scmp.lt.s32.totalorder %s181_s4, %s181_s4 }
  0x19   :  { %p188_p11 = por %p187_p10, %p186_p9 }
  0x1a   :  { %136 = vmatpush3.bf16.msra.mxu0 %v35_v3 }
  0x1b   :  { %137 = vmatprep.subr.bf16.mxu0 %v210_v0  ;;  %p189_p12 = pnand %p188_p11, %p182_p8 }
  0x1e   :  { %138 = vmatpush3.bf16.msra.mxu0 %v36_v5 }
  0x1f   :  { %139 = vmatprep.subr.bf16.mxu0 %v210_v0 }
  0x22   :  { %140 = vmatpush3.bf16.msra.mxu0 %v37_v6 }
  0x23   :  { %141 = vmatprep.subr.bf16.mxu0 %v210_v0 }
  0x26   :  { %142 = vmatpush3.bf16.msra.mxu0 %v38_v8 }
  0x27   :  { %143 = vmatprep.subr.bf16.mxu0 %v210_v0 }
  0x2a   :  { %144 = vmatpush3.bf16.msra.mxu0 %v39_v9 }
  0x2b   :  { %145 = vmatprep.subr.bf16.mxu0 %v210_v0 }
  0x2e   :  { %146 = vmatpush3.bf16.msra.mxu0 %v40_v11 }
  0x2f   :  { %147 = vmatprep.subr.bf16.mxu0 %v210_v0 }
  0x32   :  { %148 = vmatpush3.bf16.msra.mxu0 %v41_v12 }
  0x35   :  { %150 = vmatmul.mubr.bf16.vlgmr.msra.gmra.mrb[0].mxu0 %v42_v13 }
 0x108   :  { %v77_v15 = vpop.f32.mrb[0].mxu0 }
 0x109   :  { %v106_v16 = vadd.f32 %v123_v14, %v77_v15  ;;  %v151_v17 = vpop.f32.mrb[1].mxu0 }
 0x10a   :  { %v80_v18 = vpop.f32.mrb[2].mxu0 }
 0x10b   :  { %107 = vst [vmem:[#allocation6] sm:$0xff] %v106_v16  ;;  %v152_v19 = vpop.f32.mrb[3].mxu0 }
 0x10c   :  { %192 = shalt.err (!%p189_p12)
}
 0x10d   :  { %s193_s2 = scalar_lea.hbm %s266_s3, 128 }
 0x10e   :  { %p194_p13 = scmp.ne.s32.totalorder %s266_s3, %s193_s2  ;;  %p197_p0 = scmp.lt.u32.totalorder %s193_s2, %s266_s3 }
 0x110   :  { %p199_p1 = pnand %p197_p0, %p194_p13 }
 0x112   :  { %202 = shalt.err (!%p199_p1)
}
 0x113   :  { %117 = dma.vmem_to_hbm [thread:$0]  %s115_s30, 128, %s266_s3, [#allocation5]  }
 0x114   :  { %205 = dma.done.wait [#allocation5], 128  }
 0x115   :  { %206 = vsyncadd [#allocation5], 4294967168 }
 0x116   :  { %121 = vsyncpa [#allocation4], 1 }
 0x117   :  { %122 = vsyncpa [#allocation5], 1 }

</bundles_post_ra>
